<compile_context>
chip_gen: v6e
topology: v6e:2x2x1
jax: 0.10.0
libtpu: 0.0.40
codegen_flags: <defaults>
</compile_context>

<pallas_src>
import functools

import jax
import jax.numpy as jnp
from jax.experimental import pallas as pl
from jax.experimental.pallas import tpu as pltpu


def _round_up(x, m):
    return ((x + m - 1) // m) * m


def _r2_sums_kernel(y_ref, t_ref, sum_ref, sumsq_ref, rss_ref,
                    sum_acc, sumsq_acc, rss_acc, *,
                    n_rows, tile_n, tile_d, strip_rows, blocks_per_split,
                    any_mask):
    s = pl.program_id(0)            # TensorCore split of the row reduction
    i = pl.program_id(2)            # row-block index within this split (reduction, last)
    gi = s * blocks_per_split + i   # global (unclamped) row-block index

    @pl.when(i == 0)
    def _():
        sum_acc[...] = jnp.zeros_like(sum_acc)
        sumsq_acc[...] = jnp.zeros_like(sumsq_acc)
        rss_acc[...] = jnp.zeros_like(rss_acc)

    n_strips = tile_n // strip_rows

    def fold8(x):
        # (strip_rows, tile_d) -> (8, tile_d) with pure VPU adds; the 8 -> 1
        # cross-sublane collapse happens once, at the very end.
        return jnp.sum(x.reshape(strip_rows // 8, 8, tile_d), axis=0)

    def accumulate(masked):
        # Strip-mined accumulation straight into the VMEM accumulators: live
        # ranges stay at a handful of vregs regardless of how big the block is.
        @pl.loop(0, n_strips)
        def _(r):
            start = pl.multiple_of(r * strip_rows, strip_rows)
            t = t_ref[pl.ds(start, strip_rows), :].astype(jnp.float32)
            y = y_ref[pl.ds(start, strip_rows), :].astype(jnp.float32)
            if masked:
                rows = (gi * tile_n + start
                        + jax.lax.broadcasted_iota(
                            jnp.int32, (strip_rows, tile_d), 0))
                valid = rows < n_rows
                t = jnp.where(valid, t, 0.0)
                y = jnp.where(valid, y, 0.0)
            resid = t - y
            sum_acc[...] += fold8(t)
            sumsq_acc[...] += fold8(t * t)
            rss_acc[...] += fold8(resid * resid)

    if any_mask:
        # Only the row tiles that overrun N pay for the iota/select masking.
        needs_mask = (gi + 1) * tile_n > n_rows

        @pl.when(needs_mask)
        def _():
            accumulate(True)

        @pl.when(jnp.logical_not(needs_mask))
        def _():
            accumulate(False)
    else:
        accumulate(False)

    @pl.when(i == pl.num_programs(2) - 1)
    def _():
        sum_ref[...] = jnp.sum(sum_acc[...], axis=0).reshape(1, 1, tile_d)
        sumsq_ref[...] = jnp.sum(sumsq_acc[...], axis=0).reshape(1, 1, tile_d)
        rss_ref[...] = jnp.sum(rss_acc[...], axis=0).reshape(1, 1, tile_d)


def _chip_budgets():
    """(block_bytes per input block, vmem_limit_bytes) sized to the chip's VMEM."""
    vmem_cap = 64 * 1024 * 1024          # conservative default (v7x-sized VMEM)
    try:
        info = pltpu.get_tpu_info()
        vmem_cap = getattr(info, "vmem_capacity_bytes", None) or vmem_cap
    except Exception:
        pass
    if vmem_cap >= 96 * 1024 * 1024:     # v5e / v6e: 128 MiB physical VMEM
        return 8 * 1024 * 1024, 64 * 1024 * 1024
    return 4 * 1024 * 1024, 40 * 1024 * 1024   # v7x: 64 MiB physical VMEM


def _r2_sums(y, t, *, block_bytes=None, vmem_limit_bytes=None):
    """Per-column (sum_obs, sum_squared_obs, rss), each shape (D,), via Pallas."""
    N, D = y.shape

    auto_block, auto_vmem = _chip_budgets()
    if block_bytes is None:
        block_bytes = auto_block
    if vmem_limit_bytes is None:
        vmem_limit_bytes = auto_vmem

    # Lane-pack narrow D: (N, D) -> (N/pack, pack*D) so vregs/DMAs are lane-dense.
    pack = max(1, 128 // D) if D < 128 else 1
    if pack > 1:
        n_pad = (-N) % pack
        if n_pad:
            # Zero rows contribute 0 to all three sums -> safe padding.
            y = jnp.pad(y, ((0, n_pad), (0, 0)))
            t = jnp.pad(t, ((0, n_pad), (0, 0)))
        n_rows = (N + n_pad) // pack
        d_packed = pack * D
        y = y.reshape(n_rows, d_packed)
        t = t.reshape(n_rows, d_packed)
    else:
        n_rows, d_packed = N, D

    # Column tile: one 128-lane group when it divides D, else the full ragged dim.
    tile_d = 128 if d_packed % 128 == 0 else d_packed
    lane_groups = pl.cdiv(tile_d, 128)

    # Sub-32-bit inputs (bf16) pack 16 rows per vreg: keep row tiles 16-aligned
    # so the widened strips never need a sublane relayout.
    itemsize = jnp.dtype(y.dtype).itemsize
    align = 16 if itemsize < 4 else 8

    # Strip size: ~8 input vregs per array per strip bounds live ranges.
    strip_rows = max(align, 8 * max(1, 8 // lane_groups))
    strip_rows = min(strip_rows, _round_up(max(n_rows, 1), align))

    # Row tile from the per-chip VMEM budget (2 inputs x 2 pipeline buffers of
    # block_bytes each stays well inside the scoped VMEM limit on every chip).
    tile_n = block_bytes // (itemsize * tile_d)
    tile_n = max(strip_rows, (tile_n // strip_rows) * strip_rows)
    tile_n = min(tile_n, _round_up(n_rows, strip_rows))

    n_blocks = pl.cdiv(n_rows, tile_n)
    d_blocks = pl.cdiv(d_packed, tile_d)

    # Split the row reduction across the two TensorCores of a v7x chip when the
    # (parallel) feature axis alone cannot keep both busy. Harmless on 1-TC chips.
    n_split = 2 if (d_blocks == 1 and n_blocks >= 2) else 1
    blocks_per_split = pl.cdiv(n_blocks, n_split)
    padded_blocks = n_split * blocks_per_split
    any_mask = (n_rows % tile_n != 0) or (padded_blocks != n_blocks)

    if padded_blocks != n_blocks:
        # Clamp out-of-range row blocks onto the last real block; the in-kernel
        # mask (based on the *unclamped* global block index) zeroes them out.
        def in_index(s, d, i):
            return (jnp.minimum(s * blocks_per_split + i, n_blocks - 1), d)
    else:
        def in_index(s, d, i):
            return (s * blocks_per_split + i, d)

    kernel = functools.partial(
        _r2_sums_kernel, n_rows=n_rows, tile_n=tile_n, tile_d=tile_d,
        strip_rows=strip_rows, blocks_per_split=blocks_per_split,
        any_mask=any_mask)

    in_spec = pl.BlockSpec((tile_n, tile_d), in_index)
    out_spec = pl.BlockSpec((1, 1, tile_d), lambda s, d, i: (s, 0, d))
    out_struct = jax.ShapeDtypeStruct((n_split, 1, d_packed), jnp.float32)

    cost = pl.CostEstimate(
        flops=6 * n_rows * d_packed,
        transcendentals=0,
        bytes_accessed=2 * n_rows * d_packed * itemsize + 3 * n_split * d_packed * 4,
    )

    sum_obs, sum_sq, rss = pl.pallas_call(
        kernel,
        out_shape=(out_struct, out_struct, out_struct),
        grid_spec=pltpu.PrefetchScalarGridSpec(
            num_scalar_prefetch=0,
            grid=(n_split, d_blocks, blocks_per_split),
            in_specs=[in_spec, in_spec],
            out_specs=[out_spec, out_spec, out_spec],
            scratch_shapes=[
                pltpu.VMEM((8, tile_d), jnp.float32),
                pltpu.VMEM((8, tile_d), jnp.float32),
                pltpu.VMEM((8, tile_d), jnp.float32),
            ],
        ),
        compiler_params=pltpu.CompilerParams(
            dimension_semantics=("parallel", "parallel", "arbitrary"),
            vmem_limit_bytes=vmem_limit_bytes,
        ),
        cost_estimate=cost,
    )(y, t)

    # Per-TensorCore partials -> per-packed-column totals.
    sum_obs = jnp.sum(sum_obs, axis=(0, 1))
    sum_sq = jnp.sum(sum_sq, axis=(0, 1))
    rss = jnp.sum(rss, axis=(0, 1))

    if pack > 1:
        # Fold the `pack` lane-groups back to per-original-column sums.
        sum_obs = jnp.sum(sum_obs.reshape(pack, D), axis=0)
        sum_sq = jnp.sum(sum_sq.reshape(pack, D), axis=0)
        rss = jnp.sum(rss.reshape(pack, D), axis=0)
    return sum_obs, sum_sq, rss


def r2_score(y, t, adjusted=0, multioutput="uniform_average"):
    """Negative R^2 score, matching R2Score.forward(y, t, adjusted, multioutput)."""
    if y.shape != t.shape:
        raise RuntimeError("Predictions and targets are expected to have the same shape")
    if y.ndim > 2:
        raise ValueError(
            f"Expected both prediction and target to be 1D or 2D tensors, "
            f"but received tensors with dimension {y.shape}")

    was_1d = (y.ndim == 1)
    if was_1d:
        y = y[:, None]
        t = t[:, None]

    n_obs = y.shape[0]
    if n_obs < 2:
        raise ValueError("Needs at least two samples to calculate r2 score.")

    sum_obs, sum_sq, rss = _r2_sums(y, t)

    # O(D) finalize in plain JAX (matches the module's compute step).
    # TODO(synk): the module divides by tss unguarded; constant target columns
    # (tss == 0) give inf/nan, same as the reference (relevant for raw_values).
    mean_obs = sum_obs / n_obs
    tss = sum_sq - sum_obs * mean_obs
    raw_scores = 1.0 - rss / tss

    if was_1d:
        raw_scores = raw_scores[0]
        tss = tss[0]

    if multioutput == "raw_values":
        r2 = raw_scores
    elif multioutput == "uniform_average":
        r2 = jnp.mean(raw_scores)
    elif multioutput == "variance_weighted":
        r2 = jnp.sum(tss / jnp.sum(tss) * raw_scores)
    else:
        raise ValueError(
            "Argument `multioutput` must be either `raw_values`, `uniform_average` "
            f"or `variance_weighted`. Received {multioutput}.")

    if adjusted < 0 or not isinstance(adjusted, int):
        raise ValueError("`adjusted` parameter should be an integer larger or equal to 0.")

    if adjusted != 0:
        # The PyTorch module literally `raise`s Warning here; mirror it exactly.
        if adjusted > n_obs - 1:
            raise Warning("More independent regressions than data points in adjusted "
                          "r2 score. Falls back to standard r2 score.")
        elif adjusted == n_obs - 1:
            raise Warning("Division by zero in adjusted r2 score. Falls back to "
                          "standard r2 score.")
        else:
            r2 = 1 - (1 - r2) * (n_obs - 1) / (n_obs - adjusted - 1)

    return -r2


def _reference_r2(y, t, adjusted=0, multioutput="uniform_average"):
    """Pure-JAX reference mirroring the PyTorch module."""
    y = y.astype(jnp.float32)
    t = t.astype(jnp.float32)
    sum_obs = jnp.sum(t, axis=0)
    sum_squared_obs = jnp.sum(t * t, axis=0)
    rss = jnp.sum((t - y) * (t - y), axis=0)
    n_obs = t.shape[0]
    mean_obs = sum_obs / n_obs
    tss = sum_squared_obs - sum_obs * mean_obs
    raw = 1 - rss / tss
    if multioutput == "raw_values":
        r2 = raw
    elif multioutput == "uniform_average":
        r2 = jnp.mean(raw)
    else:
        r2 = jnp.sum(tss / jnp.sum(tss) * raw)
    if adjusted != 0:
        r2 = 1 - (1 - r2) * (n_obs - 1) / (n_obs - adjusted - 1)
    return -r2


if __name__ == "__main__":
    key = jax.random.PRNGKey(0)
    k1, k2, k3, k4, k5, k6, k7, k8 = jax.random.split(key, 8)

    def check(a, b, rtol=1e-4, atol=1e-5):
        a = jax.block_until_ready(a)
        assert jnp.allclose(a, b, rtol=rtol, atol=atol), (a, b)

    # Main case: (N, D) = (128, 32) -> lane-packed to (32, 128) inside wrapper.
    N, D = 128, 32
    t = jax.random.normal(k1, (N, D), dtype=jnp.float32) * 2.0 + 0.5
    y = t + 0.3 * jax.random.normal(k2, (N, D), dtype=jnp.float32)

    check(r2_score(y, t), _reference_r2(y, t))
    check(r2_score(y, t, multioutput="raw_values"),
          _reference_r2(y, t, multioutput="raw_values"))
    check(r2_score(y, t, multioutput="variance_weighted"),
          _reference_r2(y, t, multioutput="variance_weighted"))
    check(r2_score(y, t, adjusted=3), _reference_r2(y, t, adjusted=3))

    # Ragged N, narrow odd D (exercises padding + lane packing + row masking).
    N2, D2 = 100, 5
    t2 = jax.random.normal(k3, (N2, D2), dtype=jnp.float32) + 1.0
    y2 = t2 + 0.25 * jax.random.normal(k4, (N2, D2), dtype=jnp.float32)
    check(r2_score(y2, t2), _reference_r2(y2, t2))

    # 1-D inputs (D=1 path packs 128 rows per lane-row).
    check(r2_score(y2[:, 0], t2[:, 0]), _reference_r2(y2[:, 0], t2[:, 0]))

    # bf16 inputs (widened to f32 in-kernel; 16-aligned row tiles).
    y_bf = y.astype(jnp.bfloat16)
    t_bf = t.astype(jnp.bfloat16)
    check(r2_score(y_bf, t_bf),
          _reference_r2(y_bf.astype(jnp.float32), t_bf.astype(jnp.float32)),
          rtol=1e-3, atol=1e-3)

    # Multi-block reduction + 2-way TensorCore split + clamped OOB blocks +
    # runtime-selected ragged masking (small block_bytes forces several tiles).
    N3, D3 = 1200, 32
    t3 = jax.random.normal(k5, (N3, D3), dtype=jnp.float32) * 1.5 + 0.2
    y3 = t3 + 0.4 * jax.random.normal(k6, (N3, D3), dtype=jnp.float32)
    s3, q3, r3 = _r2_sums(y3, t3, block_bytes=64 * 1024)
    check(s3, jnp.sum(t3, axis=0), rtol=1e-4, atol=1e-3)
    check(q3, jnp.sum(t3 * t3, axis=0), rtol=1e-4, atol=1e-3)
    check(r3, jnp.sum((t3 - y3) ** 2, axis=0), rtol=1e-4, atol=1e-3)

    # Multiple D blocks (wide D, parallel feature axis) with ragged N.
    N4, D4 = 200, 256
    t4 = jax.random.normal(k7, (N4, D4), dtype=jnp.float32)
    y4 = t4 + 0.2 * jax.random.normal(k8, (N4, D4), dtype=jnp.float32)
    s4, q4, r4 = _r2_sums(y4, t4, block_bytes=64 * 1024)
    check(s4, jnp.sum(t4, axis=0), rtol=1e-4, atol=1e-3)
    check(q4, jnp.sum(t4 * t4, axis=0), rtol=1e-4, atol=1e-3)
    check(r4, jnp.sum((t4 - y4) ** 2, axis=0), rtol=1e-4, atol=1e-3)

    print("KERNEL_OK")
</pallas_src>

<mosaic_0001>
module attributes {stable_mosaic.version = 11 : i64} {
  func.func @_r2_sums_kernel(%arg0: i32, %arg1: i32, %arg2: i32, %arg3: memref<32x128xf32, #tpu.memory_space<vmem>>, %arg4: memref<32x128xf32, #tpu.memory_space<vmem>>, %arg5: memref<1x1x128xf32, #tpu.memory_space<vmem>>, %arg6: memref<1x1x128xf32, #tpu.memory_space<vmem>>, %arg7: memref<1x1x128xf32, #tpu.memory_space<vmem>>, %arg8: memref<8x128xf32, #tpu.memory_space<vmem>>, %arg9: memref<8x128xf32, #tpu.memory_space<vmem>>, %arg10: memref<8x128xf32, #tpu.memory_space<vmem>>) attributes {dimension_semantics = [#tpu.dimension_semantics<parallel>, #tpu.dimension_semantics<parallel>, #tpu.dimension_semantics<arbitrary>], iteration_bounds = array<i64: 1, 1, 1>, scalar_prefetch = 0 : i64, scratch_operands = 3 : i64, tpu.core_type = #tpu.core_type<tc>, window_params = [{transform_indices = @transform_0, window_bounds = array<i64: 32, 128>}, {transform_indices = @transform_1, window_bounds = array<i64: 32, 128>}, {transform_indices = @transform_2, window_bounds = array<i64: 1, 1, 128>}, {transform_indices = @transform_3, window_bounds = array<i64: 1, 1, 128>}, {transform_indices = @transform_4, window_bounds = array<i64: 1, 1, 128>}]} {
    %c0_i32 = arith.constant 0 : i32
    %0 = arith.cmpi eq, %arg2, %c0_i32 : i32
    %1 = arith.extui %0 : i1 to i32
    %c0_i32_0 = arith.constant 0 : i32
    %2 = arith.cmpi ne, %1, %c0_i32_0 : i32
    scf.if %2 {
      %cst_21 = arith.constant 0.000000e+00 : f32
      %32 = vector.broadcast %cst_21 : f32 to vector<8x128xf32>
      %c0_22 = arith.constant 0 : index
      %c0_23 = arith.constant 0 : index
      %33 = vector.load %arg8[%c0_22, %c0_23] : memref<8x128xf32, #tpu.memory_space<vmem>>, vector<8x128xf32>
      tpu.vector_store %arg8[%c0_22, %c0_23], %32 {strides = array<i32>} : memref<8x128xf32, #tpu.memory_space<vmem>>, vector<8x128xf32>,
      %cst_24 = arith.constant 0.000000e+00 : f32
      %34 = vector.broadcast %cst_24 : f32 to vector<8x128xf32>
      %c0_25 = arith.constant 0 : index
      %c0_26 = arith.constant 0 : index
      %35 = vector.load %arg9[%c0_25, %c0_26] : memref<8x128xf32, #tpu.memory_space<vmem>>, vector<8x128xf32>
      tpu.vector_store %arg9[%c0_25, %c0_26], %34 {strides = array<i32>} : memref<8x128xf32, #tpu.memory_space<vmem>>, vector<8x128xf32>,
      %cst_27 = arith.constant 0.000000e+00 : f32
      %36 = vector.broadcast %cst_27 : f32 to vector<8x128xf32>
      %c0_28 = arith.constant 0 : index
      %c0_29 = arith.constant 0 : index
      %37 = vector.load %arg10[%c0_28, %c0_29] : memref<8x128xf32, #tpu.memory_space<vmem>>, vector<8x128xf32>
      tpu.vector_store %arg10[%c0_28, %c0_29], %36 {strides = array<i32>} : memref<8x128xf32, #tpu.memory_space<vmem>>, vector<8x128xf32>,
    } else {
    }
    %c0_i32_1 = arith.constant 0 : i32
    %c1_i32 = arith.constant 1 : i32
    %3 = arith.muli %c0_i32_1, %c1_i32 : i32
    %c0_i32_2 = arith.constant 0 : i32
    %4 = arith.addi %c0_i32_2, %3 : i32
    %c32_i32 = arith.constant 32 : i32
    %5 = arith.muli %4, %c32_i32 : i32
    %6 = tpu.assume_multiple %5, 32 : i32
    %7 = arith.index_cast %6 : i32 to index
    %c0 = arith.constant 0 : index
    %8 = vector.load %arg4[%7, %c0] : memref<32x128xf32, #tpu.memory_space<vmem>>, vector<32x128xf32>
    %9 = arith.index_cast %6 : i32 to index
    %c0_3 = arith.constant 0 : index
    %10 = vector.load %arg3[%9, %c0_3] : memref<32x128xf32, #tpu.memory_space<vmem>>, vector<32x128xf32>
    %11 = arith.subf %8, %10 : vector<32x128xf32>
    %c0_4 = arith.constant 0 : index
    %c0_5 = arith.constant 0 : index
    %12 = vector.load %arg8[%c0_4, %c0_5] : memref<8x128xf32, #tpu.memory_space<vmem>>, vector<8x128xf32>
    %13 = vector.shape_cast %8 : vector<32x128xf32> to vector<4x8x128xf32>
    %cst = arith.constant dense<0.000000e+00> : vector<8x128xf32>
    %14 = vector.multi_reduction <add>, %13, %cst [0] : vector<4x8x128xf32> to vector<8x128xf32>
    %15 = arith.addf %12, %14 : vector<8x128xf32>
    %c0_6 = arith.constant 0 : index
    %c0_7 = arith.constant 0 : index
    %16 = vector.load %arg8[%c0_6, %c0_7] : memref<8x128xf32, #tpu.memory_space<vmem>>, vector<8x128xf32>
    tpu.vector_store %arg8[%c0_6, %c0_7], %15 {strides = array<i32>} : memref<8x128xf32, #tpu.memory_space<vmem>>, vector<8x128xf32>,
    %c0_8 = arith.constant 0 : index
    %c0_9 = arith.constant 0 : index
    %17 = vector.load %arg9[%c0_8, %c0_9] : memref<8x128xf32, #tpu.memory_space<vmem>>, vector<8x128xf32>
    %18 = arith.mulf %8, %8 : vector<32x128xf32>
    %19 = vector.shape_cast %18 : vector<32x128xf32> to vector<4x8x128xf32>
    %cst_10 = arith.constant dense<0.000000e+00> : vector<8x128xf32>
    %20 = vector.multi_reduction <add>, %19, %cst_10 [0] : vector<4x8x128xf32> to vector<8x128xf32>
    %21 = arith.addf %17, %20 : vector<8x128xf32>
    %c0_11 = arith.constant 0 : index
    %c0_12 = arith.constant 0 : index
    %22 = vector.load %arg9[%c0_11, %c0_12] : memref<8x128xf32, #tpu.memory_space<vmem>>, vector<8x128xf32>
    tpu.vector_store %arg9[%c0_11, %c0_12], %21 {strides = array<i32>} : memref<8x128xf32, #tpu.memory_space<vmem>>, vector<8x128xf32>,
    %c0_13 = arith.constant 0 : index
    %c0_14 = arith.constant 0 : index
    %23 = vector.load %arg10[%c0_13, %c0_14] : memref<8x128xf32, #tpu.memory_space<vmem>>, vector<8x128xf32>
    %24 = arith.mulf %11, %11 : vector<32x128xf32>
    %25 = vector.shape_cast %24 : vector<32x128xf32> to vector<4x8x128xf32>
    %cst_15 = arith.constant dense<0.000000e+00> : vector<8x128xf32>
    %26 = vector.multi_reduction <add>, %25, %cst_15 [0] : vector<4x8x128xf32> to vector<8x128xf32>
    %27 = arith.addf %23, %26 : vector<8x128xf32>
    %c0_16 = arith.constant 0 : index
    %c0_17 = arith.constant 0 : index
    %28 = vector.load %arg10[%c0_16, %c0_17] : memref<8x128xf32, #tpu.memory_space<vmem>>, vector<8x128xf32>
    tpu.vector_store %arg10[%c0_16, %c0_17], %27 {strides = array<i32>} : memref<8x128xf32, #tpu.memory_space<vmem>>, vector<8x128xf32>,
    %c1_i32_18 = arith.constant 1 : i32
    %c0_i32_19 = arith.constant 0 : i32
    %29 = arith.cmpi eq, %arg2, %c0_i32_19 : i32
    %30 = arith.extui %29 : i1 to i32
    %c0_i32_20 = arith.constant 0 : i32
    %31 = arith.cmpi ne, %30, %c0_i32_20 : i32
    scf.if %31 {
      %c0_21 = arith.constant 0 : index
      %c0_22 = arith.constant 0 : index
      %32 = vector.load %arg8[%c0_21, %c0_22] : memref<8x128xf32, #tpu.memory_space<vmem>>, vector<8x128xf32>
      %cst_23 = arith.constant dense<0.000000e+00> : vector<128xf32>
      %33 = vector.multi_reduction <add>, %32, %cst_23 [0] : vector<8x128xf32> to vector<128xf32>
      %34 = vector.shape_cast %33 : vector<128xf32> to vector<1x1x128xf32>
      %c0_24 = arith.constant 0 : index
      %c0_25 = arith.constant 0 : index
      %c0_26 = arith.constant 0 : index
      %35 = vector.load %arg5[%c0_24, %c0_25, %c0_26] : memref<1x1x128xf32, #tpu.memory_space<vmem>>, vector<1x1x128xf32>
      tpu.vector_store %arg5[%c0_24, %c0_25, %c0_26], %34 {strides = array<i32>} : memref<1x1x128xf32, #tpu.memory_space<vmem>>, vector<1x1x128xf32>,
      %c0_27 = arith.constant 0 : index
      %c0_28 = arith.constant 0 : index
      %36 = vector.load %arg9[%c0_27, %c0_28] : memref<8x128xf32, #tpu.memory_space<vmem>>, vector<8x128xf32>
      %cst_29 = arith.constant dense<0.000000e+00> : vector<128xf32>
      %37 = vector.multi_reduction <add>, %36, %cst_29 [0] : vector<8x128xf32> to vector<128xf32>
      %38 = vector.shape_cast %37 : vector<128xf32> to vector<1x1x128xf32>
      %c0_30 = arith.constant 0 : index
      %c0_31 = arith.constant 0 : index
      %c0_32 = arith.constant 0 : index
      %39 = vector.load %arg6[%c0_30, %c0_31, %c0_32] : memref<1x1x128xf32, #tpu.memory_space<vmem>>, vector<1x1x128xf32>
      tpu.vector_store %arg6[%c0_30, %c0_31, %c0_32], %38 {strides = array<i32>} : memref<1x1x128xf32, #tpu.memory_space<vmem>>, vector<1x1x128xf32>,
      %c0_33 = arith.constant 0 : index
      %c0_34 = arith.constant 0 : index
      %40 = vector.load %arg10[%c0_33, %c0_34] : memref<8x128xf32, #tpu.memory_space<vmem>>, vector<8x128xf32>
      %cst_35 = arith.constant dense<0.000000e+00> : vector<128xf32>
      %41 = vector.multi_reduction <add>, %40, %cst_35 [0] : vector<8x128xf32> to vector<128xf32>
      %42 = vector.shape_cast %41 : vector<128xf32> to vector<1x1x128xf32>
      %c0_36 = arith.constant 0 : index
      %c0_37 = arith.constant 0 : index
      %c0_38 = arith.constant 0 : index
      %43 = vector.load %arg7[%c0_36, %c0_37, %c0_38] : memref<1x1x128xf32, #tpu.memory_space<vmem>>, vector<1x1x128xf32>
      tpu.vector_store %arg7[%c0_36, %c0_37, %c0_38], %42 {strides = array<i32>} : memref<1x1x128xf32, #tpu.memory_space<vmem>>, vector<1x1x128xf32>,
    } else {
    }
    return
  }
  func.func @transform_0(%arg0: i32, %arg1: i32, %arg2: i32) -> (i32, i32) {
    %c1_i32 = arith.constant 1 : i32
    %0 = arith.muli %arg0, %c1_i32 : i32
    %1 = arith.addi %0, %arg2 : i32
    %c0_i32 = arith.constant 0 : i32
    return %1, %arg1 : i32, i32
  }
  func.func @transform_1(%arg0: i32, %arg1: i32, %arg2: i32) -> (i32, i32) {
    %c1_i32 = arith.constant 1 : i32
    %0 = arith.muli %arg0, %c1_i32 : i32
    %1 = arith.addi %0, %arg2 : i32
    %c0_i32 = arith.constant 0 : i32
    return %1, %arg1 : i32, i32
  }
  func.func @transform_2(%arg0: i32, %arg1: i32, %arg2: i32) -> (i32, i32, i32) {
    %c0_i32 = arith.constant 0 : i32
    %c0_i32_0 = arith.constant 0 : i32
    return %arg0, %c0_i32, %arg1 : i32, i32, i32
  }
  func.func @transform_3(%arg0: i32, %arg1: i32, %arg2: i32) -> (i32, i32, i32) {
    %c0_i32 = arith.constant 0 : i32
    %c0_i32_0 = arith.constant 0 : i32
    return %arg0, %c0_i32, %arg1 : i32, i32, i32
  }
  func.func @transform_4(%arg0: i32, %arg1: i32, %arg2: i32) -> (i32, i32, i32) {
    %c0_i32 = arith.constant 0 : i32
    %c0_i32_0 = arith.constant 0 : i32
    return %arg0, %c0_i32, %arg1 : i32, i32, i32
  }
}

</mosaic_0001>

<bundles_post_ra>
// kernel: tpu_custom_call.1
= control target key start
LH: loop header
LB: loop body
LE: loop exit
PB: predicated region body
PF: predicated region fallthrough
CT: control target
= control target key end

     0   :  { %10 = vsyncpa [#allocation6], 0  ;;  %s333_s0 = inlined_call_operand.hbm [shape: f32[32,128], index: 0, kind: input, shape index: {}]   ;;  %s334_s1 = inlined_call_operand.hbm [shape: f32[32,128], index: 1, kind: input, shape index: {}]   ;;  %s335_s2 = inlined_call_operand.hbm [shape: f32[1,1,128], index: 2, kind: output, shape index: {0}]   ;;  %s336_s3 = inlined_call_operand.hbm [shape: f32[1,1,128], index: 3, kind: output, shape index: {1}]   ;;  %s337_s4 = inlined_call_operand.hbm [shape: f32[1,1,128], index: 4, kind: output, shape index: {2}]  }
   0x1   :  { %11 = vsyncpa [#allocation9], 0 }
   0x2   :  { %12 = vsyncpa [#allocation7], 0 }
   0x3   :  { %13 = vsyncpa [#allocation12], 0  ;;  %s286_s15 = smov [#allocation5]  }
   0x4   :  { %s23_s16 = sshll.u32 %s286_s15, 4  ;;  %s24_s16 = int_to_ptr.vmem [resolvable:$true] %s23_s16 }
   0x5   :  { %s186_s17 = scalar_lea.vmem %s24_s16, 512  ;;  %p191_p1 = scmp.lt.s32.totalorder %s24_s16, %s24_s16 }
   0x6   :  { %p187_p0 = scmp.ne.s32.totalorder %s24_s16, %s186_s17  ;;  %p192_p2 = scmp.lt.s32.totalorder %s186_s17, %s186_s17 }
   0x8   :  { %p193_p3 = por %p192_p2, %p191_p1 }
   0xa   :  { %p194_p4 = pnand %p193_p3, %p187_p0 }
   0xc   :  { %197 = shalt.err (!%p194_p4)
}
   0xd   :  { %s287_s18 = smov 128   ;;  %s288_s19 = smov 8  }
   0xe   :  { %29 = dma.hbm_to_vmem [thread:$0]  %s333_s0, 512, %s24_s16, [#allocation6], %s287_s18, %s287_s18, %s288_s19  }
   0xf   :  { %s289_s22 = smov [#allocation8]  }
  0x10   :  { %s39_s23 = sshll.u32 %s289_s22, 4  ;;  %s40_s23 = int_to_ptr.vmem [resolvable:$true] %s39_s23 }
  0x11   :  { %s206_s24 = scalar_lea.vmem %s40_s23, 512  ;;  %p211_p6 = scmp.lt.s32.totalorder %s40_s23, %s40_s23 }
  0x12   :  { %p207_p5 = scmp.ne.s32.totalorder %s40_s23, %s206_s24  ;;  %p212_p7 = scmp.lt.s32.totalorder %s206_s24, %s206_s24 }
  0x14   :  { %p213_p8 = por %p212_p7, %p211_p6 }
  0x16   :  { %p214_p9 = pnand %p213_p8, %p207_p5 }
  0x18   :  { %217 = shalt.err (!%p214_p9)
}
  0x19   :  { %45 = dma.hbm_to_vmem [thread:$0]  %s334_s1, 512, %s40_s23, [#allocation9], %s287_s18, %s287_s18, %s288_s19  }
  0x1a   :  { %278 = dma.done.wait [#allocation6], 512  }
  0x1b   :  { %279 = vsyncadd [#allocation6], 4294966784 }
  0x1c   :  { %280 = dma.done.wait [#allocation9], 512  }
  0x1d   :  { %281 = vsyncadd [#allocation9], 4294966784  ;;  %v63_v0 = vld [vmem:[#allocation8] sm:$0xff]  ;;  %v64_v1 = vld [vmem:[#allocation8 + $0x8] sm:$0xff]  ;;  %s290_s0 = smov [#allocation10]   ;;  %s291_s27 = smov [#allocation11]  }
  0x1e   :  { %v65_v2 = vld [vmem:[#allocation8 + $0x10] sm:$0xff]  ;;  %v66_v3 = vld [vmem:[#allocation8 + $0x18] sm:$0xff]  ;;  %v82_v4 = vmul.f32 %v63_v0, %v63_v0  ;;  %v83_v5 = vmul.f32 %v64_v1, %v64_v1  ;;  %v76_v7 = vadd.f32 %v64_v1, %v63_v0  ;;  %v67_v8 = vld [vmem:[#allocation5] sm:$0xff]  ;;  %s134_s1 = sshll.u32 %s290_s0, 4  ;;  %s144_s28 = sshll.u32 %s291_s27, 4  ;;  %s135_s1 = int_to_ptr.vmem [resolvable:$true] %s134_s1  ;;  %s145_s28 = int_to_ptr.vmem [resolvable:$true] %s144_s28 }
  0x1f   :  { %v84_v6 = vmul.f32 %v65_v2, %v65_v2  ;;  %v68_v9 = vld [vmem:[#allocation5 + $0x8] sm:$0xff]  ;;  %v85_v10 = vmul.f32 %v66_v3, %v66_v3  ;;  %v69_v11 = vld [vmem:[#allocation5 + $0x10] sm:$0xff]  ;;  %v70_v12 = vld [vmem:[#allocation5 + $0x18] sm:$0xff]  ;;  %v71_v13 = vsub.f32 %v63_v0, %v67_v8  ;;  %s292_s29 = smov [#allocation13]   ;;  %s218_s5 = scalar_lea.vmem %s135_s1, 16 }
  0x20   :  { %v72_v14 = vsub.f32 %v64_v1, %v68_v9  ;;  %v86_v15 = vadd.f32 %v83_v5, %v82_v4  ;;  %v77_v16 = vadd.f32 %v76_v7, %v65_v2  ;;  %v73_v17 = vsub.f32 %v65_v2, %v69_v11  ;;  %s154_s30 = sshll.u32 %s292_s29, 4  ;;  %p219_p10 = scmp.ne.s32.totalorder %s135_s1, %s218_s5  ;;  %s155_s30 = int_to_ptr.vmem [resolvable:$true] %s154_s30 }
  0x21   :  { %v74_v18 = vsub.f32 %v66_v3, %v70_v12  ;;  %v92_v19 = vmul.f32 %v71_v13, %v71_v13  ;;  %s222_s6 = scalar_lea.vmem %s135_s1, 32  ;;  %p223_p11 = scmp.lt.s32.totalorder %s135_s1, %s135_s1 }
  0x22   :  { %v93_v20 = vmul.f32 %v72_v14, %v72_v14  ;;  %v87_v21 = vadd.f32 %v86_v15, %v84_v6  ;;  %v78_v22 = vadd.f32 %v77_v16, %v66_v3  ;;  %v94_v23 = vmul.f32 %v73_v17, %v73_v17  ;;  %p224_p12 = scmp.lt.s32.totalorder %s222_s6, %s218_s5 }
  0x23   :  { %v95_v24 = vmul.f32 %v74_v18, %v74_v18 }
  0x24   :  { %v96_v25 = vadd.f32 %v93_v20, %v92_v19  ;;  %v88_v26 = vadd.f32 %v87_v21, %v85_v10  ;;  %v105_v27 = vrot.slane %v78_v22, 4  ;;  %p225_p13 = por %p224_p12, %p223_p11 }
  0x26   :  { %v97_v28 = vadd.f32 %v96_v25, %v94_v23  ;;  %v113_v29 = vrot.slane %v88_v26, 4  ;;  %v106_v30 = vadd.f32 %v105_v27, %v78_v22  ;;  %p226_p0 = pnand %p225_p13, %p219_p10 }
  0x28   :  { %v98_v31 = vadd.f32 %v97_v28, %v95_v24  ;;  %v114_v32 = vadd.f32 %v113_v29, %v88_v26  ;;  %v107_v33 = vrot.slane %v106_v30, 2 }
  0x2a   :  { %v121_v34 = vrot.slane %v98_v31, 4  ;;  %v115_v35 = vrot.slane %v114_v32, 2  ;;  %v108_v36 = vadd.f32 %v107_v33, %v106_v30 }
  0x2c   :  { %v122_v37 = vadd.f32 %v121_v34, %v98_v31  ;;  %v116_v38 = vadd.f32 %v115_v35, %v114_v32  ;;  %v109_v39 = vrot.slane %v108_v36, 1 }
  0x2e   :  { %v123_v40 = vrot.slane %v122_v37, 2  ;;  %v117_v41 = vrot.slane %v116_v38, 1  ;;  %v110_v42 = vadd.f32 %v109_v39, %v108_v36 }
  0x30   :  { %v124_v43 = vadd.f32 %v123_v40, %v122_v37  ;;  %v118_v44 = vadd.f32 %v117_v41, %v116_v38  ;;  %111 = vst [vmem:[#allocation10] sm:$0x1] %v110_v42 }
  0x32   :  { %v125_v45 = vrot.slane %v124_v43, 1 }
  0x33   :  { %229 = shalt.err (!%p226_p0)
}
  0x34   :  { %137 = dma.vmem_to_hbm [thread:$0]  %s135_s1, 16, %s335_s2, [#allocation7]   ;;  %119 = vst [vmem:[#allocation11] sm:$0x1] %v118_v44  ;;  %v126_v46 = vadd.f32 %v125_v45, %v124_v43 }
  0x35   :  { %s238_s9 = scalar_lea.vmem %s145_s28, 16  ;;  %s242_s10 = scalar_lea.vmem %s145_s28, 32 }
  0x36   :  { %p239_p1 = scmp.ne.s32.totalorder %s145_s28, %s238_s9  ;;  %p243_p2 = scmp.lt.s32.totalorder %s145_s28, %s145_s28 }
  0x37   :  { %p244_p3 = scmp.lt.s32.totalorder %s242_s10, %s238_s9 }
  0x39   :  { %p245_p4 = por %p244_p3, %p243_p2 }
  0x3b   :  { %p246_p5 = pnand %p245_p4, %p239_p1 }
  0x3d   :  { %249 = shalt.err (!%p246_p5)
}
  0x3e   :  { %147 = dma.vmem_to_hbm [thread:$0]  %s145_s28, 16, %s336_s3, [#allocation12]   ;;  %127 = vst [vmem:[#allocation13] sm:$0x1] %v126_v46 }
  0x3f   :  { %s258_s13 = scalar_lea.vmem %s155_s30, 16  ;;  %s262_s14 = scalar_lea.vmem %s155_s30, 32 }
  0x40   :  { %p259_p6 = scmp.ne.s32.totalorder %s155_s30, %s258_s13  ;;  %p263_p7 = scmp.lt.s32.totalorder %s155_s30, %s155_s30 }
  0x41   :  { %p264_p8 = scmp.lt.s32.totalorder %s262_s14, %s258_s13 }
  0x43   :  { %p265_p9 = por %p264_p8, %p263_p7 }
  0x45   :  { %p266_p10 = pnand %p265_p9, %p259_p6 }
  0x47   :  { %269 = shalt.err (!%p266_p10)
}
  0x48   :  { %157 = dma.vmem_to_hbm [thread:$0]  %s155_s30, 16, %s337_s4, [#allocation12]  }
  0x49   :  { %282 = dma.done.wait [#allocation7], 16  }
  0x4a   :  { %283 = vsyncadd [#allocation7], 4294967280 }
  0x4b   :  { %284 = dma.done.wait [#allocation12], 32  }
  0x4c   :  { %285 = vsyncadd [#allocation12], 4294967264 }
  0x4d   :  { %167 = vsyncpa [#allocation6], 1 }
  0x4e   :  { %168 = vsyncpa [#allocation9], 1 }
  0x4f   :  { %169 = vsyncpa [#allocation7], 1 }
  0x50   :  { %170 = vsyncpa [#allocation12], 1 }

</bundles_post_ra>
